<compile_context>
chip_gen: v5e
topology: v5e:2x2
jax: 0.10.0
libtpu: 0.0.40
codegen_flags: <defaults>
</compile_context>

<pallas_src>
import functools

import jax
import jax.numpy as jnp
from jax.experimental import pallas as pl
from jax.experimental.pallas import tpu as pltpu

LANE = 128
SUB = 8                      # f32 sublane granularity
GRAN = 16                    # row granularity: lcm(f32 sublanes=8, bf16 sublanes=16)
MAX_TILE_ROWS = 2048         # 2048 x 128 f32 = 1 MiB per input buffer
VMEM_LIMIT = 32 * 1024 * 1024


def _cdiv(a, b):
    return -(-a // b)


def _choose_tiling(rows):
    """Pick (tile_rows, n_blocks) for `rows` lane-rows of (padded) data.

    Fixed large tiles + cdiv grid (padded tail masked in-kernel), and at least
    2 blocks for mid-sized inputs so dimension_semantics=("parallel",) can
    shard across both TensorCores on v7x.
    """
    if rows <= GRAN:
        tile_rows = GRAN
    elif rows <= 2 * MAX_TILE_ROWS:
        tile_rows = _cdiv(_cdiv(rows, 2), GRAN) * GRAN
    else:
        tile_rows = MAX_TILE_ROWS
    return tile_rows, _cdiv(rows, tile_rows)


def _pow_small(base, gamma):
    """base**gamma; VPU multiplies for small integer gamma (common gamma=2)."""
    g = float(gamma)
    if g.is_integer() and 0 <= g <= 8:
        gi = int(g)
        if gi == 0:
            return jnp.ones_like(base)
        out = base
        for _ in range(gi - 1):
            out = out * base
        return out
    # Non-integer gamma: EUP log+exp pow fallback.
    return base ** g


def _focal_terms(x, t, alpha, gamma):
    # Numerically stable BCE-with-logits (matches PyTorch's formulation):
    #   bce = max(x, 0) - x*t + log1p(exp(-|x|))
    bce = jnp.maximum(x, 0.0) - x * t + jnp.log1p(jnp.exp(-jnp.abs(x)))
    pt = jnp.exp(-bce)
    if float(alpha) == 1.0:
        alpha_factor = t                       # alpha*t + 0*(1-t)
    else:
        alpha_factor = alpha * t + (1.0 - alpha) * (1.0 - t)
    return alpha_factor * _pow_small(1.0 - pt, gamma) * bce


def _focal_partial_sum_kernel(x_ref, t_ref, psum_ref, *, alpha, gamma, valid):
    """Per-grid-step (8,128) partial sum; no scalar accumulator, no XLU."""
    x = x_ref[...].astype(jnp.float32)
    t = t_ref[...].astype(jnp.float32)
    fl = _focal_terms(x, t, alpha, gamma)
    tile_rows = fl.shape[0]
    if valid is not None:
        # Zero out the padded tail (only the last grid block contains padding).
        base = pl.program_id(0) * (tile_rows * LANE)
        row = jax.lax.broadcasted_iota(jnp.int32, fl.shape, 0)
        lane = jax.lax.broadcasted_iota(jnp.int32, fl.shape, 1)
        fl = jnp.where(base + row * LANE + lane < valid, fl, 0.0)
    # Fold rows into a single vreg tile: pure lane/sublane-parallel VPU adds.
    psum_ref[0, :, :] = fl.reshape(tile_rows // SUB, SUB, LANE).sum(axis=0)


def _focal_elementwise_kernel(x_ref, t_ref, o_ref, *, alpha, gamma):
    x = x_ref[...].astype(jnp.float32)
    t = t_ref[...].astype(jnp.float32)
    o_ref[...] = _focal_terms(x, t, alpha, gamma)


def focal_loss(inputs, targets, alpha=1.0, gamma=2.0, reduction='mean',
               narrow_targets=True):
    """Pallas TPU implementation of FocalLoss.forward."""
    orig_shape = inputs.shape
    total = int(inputs.size)
    assert targets.shape == orig_shape

    rows = max(_cdiv(total, LANE), 1)
    tile_rows, n_blocks = _choose_tiling(rows)
    rows_padded = tile_rows * n_blocks
    pad = rows_padded * LANE - total

    # Narrow targets to bf16 (exact for binary 0/1 targets) to cut HBM reads;
    # keep f32 for soft targets when narrow_targets=False.
    t_work_dtype = jnp.bfloat16 if narrow_targets else jnp.float32

    x_flat = inputs.reshape(-1)
    t_flat = targets.reshape(-1).astype(t_work_dtype)
    if pad:
        x_flat = jnp.pad(x_flat, (0, pad))
        t_flat = jnp.pad(t_flat, (0, pad))
    x2 = x_flat.reshape(rows_padded, LANE)
    t2 = t_flat.reshape(rows_padded, LANE)

    in_specs = [
        pl.BlockSpec((tile_rows, LANE), lambda i: (i, 0)),
        pl.BlockSpec((tile_rows, LANE), lambda i: (i, 0)),
    ]
    compiler_params = pltpu.CompilerParams(
        dimension_semantics=("parallel",),
        vmem_limit_bytes=VMEM_LIMIT)

    if reduction in ('mean', 'sum'):
        kernel = functools.partial(
            _focal_partial_sum_kernel, alpha=float(alpha), gamma=float(gamma),
            valid=(total if pad else None))
        partials = pl.pallas_call(
            kernel,
            out_shape=jax.ShapeDtypeStruct((n_blocks, SUB, LANE), jnp.float32),
            grid_spec=pltpu.PrefetchScalarGridSpec(
                num_scalar_prefetch=0,
                grid=(n_blocks,),
                in_specs=in_specs,
                out_specs=pl.BlockSpec((1, SUB, LANE), lambda i: (i, 0, 0)),
            ),
            compiler_params=compiler_params,
        )(x2, t2)
        # Tiny finishing reduce (n_blocks * 1024 floats) in plain JAX.
        s = jnp.sum(partials)
        if reduction == 'mean':
            return s / jnp.float32(total)
        return s
    else:  # reduction == 'none'
        kernel = functools.partial(
            _focal_elementwise_kernel, alpha=float(alpha), gamma=float(gamma))
        out = pl.pallas_call(
            kernel,
            out_shape=jax.ShapeDtypeStruct((rows_padded, LANE), jnp.float32),
            grid_spec=pltpu.PrefetchScalarGridSpec(
                num_scalar_prefetch=0,
                grid=(n_blocks,),
                in_specs=in_specs,
                out_specs=pl.BlockSpec((tile_rows, LANE), lambda i: (i, 0)),
            ),
            compiler_params=compiler_params,
        )(x2, t2)
        out = out.reshape(-1)
        if pad:
            out = out[:total]
        return out.reshape(orig_shape)


def focal_loss_ref(inputs, targets, alpha=1.0, gamma=2.0, reduction='mean'):
    """Pure-JAX reference mirroring the PyTorch module."""
    x = inputs.astype(jnp.float32)
    t = targets.astype(jnp.float32)
    bce = jnp.maximum(x, 0.0) - x * t + jnp.log1p(jnp.exp(-jnp.abs(x)))
    pt = jnp.exp(-bce)
    alpha_factor = alpha * t + (1.0 - alpha) * (1.0 - t)
    fl = alpha_factor * (1.0 - pt) ** gamma * bce
    if reduction == 'mean':
        return fl.mean()
    elif reduction == 'sum':
        return fl.sum()
    return fl


if __name__ == "__main__":
    key = jax.random.PRNGKey(0)
    k_x, k_t, k_x2, k_t2 = jax.random.split(key, 4)

    # NCHW logits + binary targets (same shape), as BCEWithLogits expects.
    shape = (2, 4, 16, 16)
    inputs = jax.random.normal(k_x, shape, dtype=jnp.float32) * 2.0
    targets = jax.random.bernoulli(k_t, 0.5, shape).astype(jnp.float32)

    # 'mean' (module default)
    out = jax.block_until_ready(
        focal_loss(inputs, targets, alpha=1.0, gamma=2.0, reduction='mean'))
    ref = focal_loss_ref(inputs, targets, alpha=1.0, gamma=2.0,
                         reduction='mean')
    assert jnp.allclose(out, ref, rtol=1e-5, atol=1e-6), (out, ref)

    # 'sum'
    out_sum = jax.block_until_ready(
        focal_loss(inputs, targets, reduction='sum'))
    ref_sum = focal_loss_ref(inputs, targets, reduction='sum')
    assert jnp.allclose(out_sum, ref_sum, rtol=1e-5, atol=1e-4), (out_sum,
                                                                  ref_sum)

    # 'none' (elementwise)
    out_none = jax.block_until_ready(
        focal_loss(inputs, targets, reduction='none'))
    ref_none = focal_loss_ref(inputs, targets, reduction='none')
    assert jnp.allclose(out_none, ref_none, rtol=1e-5, atol=1e-6)

    # Awkward (non-multiple-of-1024) size: exercises the padded/masked tail
    # path and non-default alpha.
    shape2 = (3, 5, 7)
    inputs2 = jax.random.normal(k_x2, shape2, dtype=jnp.float32)
    targets2 = jax.random.bernoulli(k_t2, 0.3, shape2).astype(jnp.float32)
    out2 = jax.block_until_ready(
        focal_loss(inputs2, targets2, alpha=0.25, gamma=2.0, reduction='mean'))
    ref2 = focal_loss_ref(inputs2, targets2, alpha=0.25, gamma=2.0,
                          reduction='mean')
    assert jnp.allclose(out2, ref2, rtol=1e-5, atol=1e-6), (out2, ref2)

    print("KERNEL_OK")
</pallas_src>

<mosaic_0001>
module attributes {stable_mosaic.version = 11 : i64} {
  func.func @_focal_partial_sum_kernel(%arg0: i32, %arg1: memref<16x128xf32, #tpu.memory_space<vmem>>, %arg2: memref<16x128xbf16, #tpu.memory_space<vmem>>, %arg3: memref<1x8x128xf32, #tpu.memory_space<vmem>>) attributes {dimension_semantics = [#tpu.dimension_semantics<parallel>], iteration_bounds = array<i64: 1>, scalar_prefetch = 0 : i64, scratch_operands = 0 : i64, tpu.core_type = #tpu.core_type<tc>, window_params = [{transform_indices = @transform_0, window_bounds = array<i64: 16, 128>}, {transform_indices = @transform_1, window_bounds = array<i64: 16, 128>}, {transform_indices = @transform_2, window_bounds = array<i64: 1, 8, 128>}]} {
    %c0 = arith.constant 0 : index
    %c0_0 = arith.constant 0 : index
    %0 = vector.load %arg1[%c0, %c0_0] : memref<16x128xf32, #tpu.memory_space<vmem>>, vector<16x128xf32>
    %c0_1 = arith.constant 0 : index
    %c0_2 = arith.constant 0 : index
    %1 = vector.load %arg2[%c0_1, %c0_2] : memref<16x128xbf16, #tpu.memory_space<vmem>>, vector<16x128xbf16>
    %2 = arith.extf %1 : vector<16x128xbf16> to vector<16x128xf32>
    %cst = arith.constant 0.000000e+00 : f32
    %3 = vector.broadcast %cst : f32 to vector<16x128xf32>
    %4 = arith.maximumf %0, %3 : vector<16x128xf32>
    %5 = arith.mulf %0, %2 : vector<16x128xf32>
    %6 = arith.subf %4, %5 : vector<16x128xf32>
    %7 = math.absf %0 : vector<16x128xf32>
    %cst_3 = arith.constant 0.000000e+00 : f32
    %8 = vector.broadcast %cst_3 : f32 to vector<16x128xf32>
    %9 = arith.subf %8, %7 : vector<16x128xf32>
    %10 = math.exp %9 : vector<16x128xf32>
    %11 = math.log1p %10 : vector<16x128xf32>
    %12 = arith.addf %6, %11 : vector<16x128xf32>
    %cst_4 = arith.constant 0.000000e+00 : f32
    %13 = vector.broadcast %cst_4 : f32 to vector<16x128xf32>
    %14 = arith.subf %13, %12 : vector<16x128xf32>
    %15 = math.exp %14 : vector<16x128xf32>
    %cst_5 = arith.constant 1.000000e+00 : f32
    %16 = vector.broadcast %cst_5 : f32 to vector<16x128xf32>
    %17 = arith.subf %16, %15 : vector<16x128xf32>
    %18 = arith.mulf %17, %17 : vector<16x128xf32>
    %19 = arith.mulf %2, %18 : vector<16x128xf32>
    %20 = arith.mulf %19, %12 : vector<16x128xf32>
    %21 = vector.shape_cast %20 : vector<16x128xf32> to vector<2x8x128xf32>
    %cst_6 = arith.constant dense<0.000000e+00> : vector<8x128xf32>
    %22 = vector.multi_reduction <add>, %21, %cst_6 [0] : vector<2x8x128xf32> to vector<8x128xf32>
    %c0_7 = arith.constant 0 : index
    %c0_8 = arith.constant 0 : index
    %c0_9 = arith.constant 0 : index
    %23 = vector.load %arg3[%c0_7, %c0_8, %c0_9] : memref<1x8x128xf32, #tpu.memory_space<vmem>>, vector<1x8x128xf32>
    %24 = vector.shape_cast %23 : vector<1x8x128xf32> to vector<8x128xf32>
    %25 = vector.shape_cast %22 : vector<8x128xf32> to vector<1x8x128xf32>
    tpu.vector_store %arg3[%c0_7, %c0_8, %c0_9], %25 {strides = array<i32>} : memref<1x8x128xf32, #tpu.memory_space<vmem>>, vector<1x8x128xf32>,
    return
  }
  func.func @transform_0(%arg0: i32) -> (i32, i32) {
    %c0_i32 = arith.constant 0 : i32
    %c0_i32_0 = arith.constant 0 : i32
    return %arg0, %c0_i32 : i32, i32
  }
  func.func @transform_1(%arg0: i32) -> (i32, i32) {
    %c0_i32 = arith.constant 0 : i32
    %c0_i32_0 = arith.constant 0 : i32
    return %arg0, %c0_i32 : i32, i32
  }
  func.func @transform_2(%arg0: i32) -> (i32, i32, i32) {
    %c0_i32 = arith.constant 0 : i32
    %c0_i32_0 = arith.constant 0 : i32
    %c0_i32_1 = arith.constant 0 : i32
    return %arg0, %c0_i32, %c0_i32_0 : i32, i32, i32
  }
}

</mosaic_0001>

<bundles_post_ra>
// kernel: tpu_custom_call.1
= control target key start
LH: loop header
LB: loop body
LE: loop exit
PB: predicated region body
PF: predicated region fallthrough
CT: control target
= control target key end

     0   :  { %7 = vsyncpa [#allocation3], 0  ;;  %s250_s0 = inlined_call_operand.hbm [shape: f32[16,128], index: 0, kind: input, shape index: {}]   ;;  %s251_s1 = inlined_call_operand.hbm [shape: bf16[16,128], index: 1, kind: input, shape index: {}]   ;;  %s252_s2 = inlined_call_operand.hbm [shape: f32[1,8,128], index: 2, kind: output, shape index: {}]  }
   0x1   :  { %8 = vsyncpa [#allocation6], 0 }
   0x2   :  { %9 = vsyncpa [#allocation4], 0  ;;  %s14_s11 = sshll.u32 %s250_s0, 4  ;;  %s219_s12 = smov [#allocation2]   ;;  %s15_s11 = int_to_ptr.hbm [resolvable:$true] %s14_s11 }
   0x3   :  { %s16_s13 = sshll.u32 %s219_s12, 4  ;;  %s27_s16 = sshll.u32 %s251_s1, 4  ;;  %s17_s13 = int_to_ptr.vmem [resolvable:$true] %s16_s13  ;;  %s28_s16 = int_to_ptr.hbm [resolvable:$true] %s27_s16 }
   0x4   :  { %s220_s17 = smov 128   ;;  %s221_s18 = smov 8  }
   0x5   :  { %22 = dma.hbm_to_vmem [thread:$0]  %s15_s11, 256, %s17_s13, [#allocation3], %s220_s17, %s220_s17, %s221_s18  }
   0x6   :  { %s222_s19 = smov [#allocation5]   ;;  %s223_s21 = smov 64  }
   0x7   :  { %s29_s20 = sshll.u32 %s222_s19, 4  ;;  %s224_s22 = smov 4   ;;  %s30_s20 = int_to_ptr.vmem [resolvable:$true] %s29_s20 }
   0x8   :  { %35 = dma.hbm_to_vmem [thread:$0]  %s28_s16, 128, %s30_s20, [#allocation6], %s223_s21, %s223_s21, %s224_s22  }
   0x9   :  { %213 = dma.done.wait [#allocation3], 256  }
   0xa   :  { %214 = vsyncadd [#allocation3], 4294967040 }
   0xb   :  { %215 = dma.done.wait [#allocation6], 128  }
   0xc   :  { %216 = vsyncadd [#allocation6], 4294967168  ;;  %v44_v0 = vld [vmem:[#allocation2] sm:$0xff]  ;;  %v45_v1 = vld [vmem:[#allocation2 + $0x8] sm:$0xff]  ;;  %s225_s0 = smov [#allocation7]   ;;  %s107_s25 = sshll.u32 %s252_s2, 4  ;;  %s108_s25 = int_to_ptr.hbm [resolvable:$true] %s107_s25 }
   0xd   :  { %v56_v2 = vand.u32 2147483647, %v44_v0  ;;  %v57_v3 = vand.u32 2147483647, %v45_v1  ;;  %v119_v8 = vld [vmem:[#allocation5] sm:$0xff]   ;;  %v50_v18 = vmax.f32 %v44_v0, 0.0 }
   0xe   :  { %v120_v11 = vunpack.c.l.bf16 %v119_v8  ;;  %v121_v14 = vunpack.c.h.bf16 %v119_v8  ;;  %v51_v22 = vmax.f32 %v45_v1, 0.0  ;;  %s105_s1 = sshll.u32 %s225_s0, 4  ;;  %s106_s1 = int_to_ptr.vmem [resolvable:$true] %s105_s1 }
   0xf   :  { %v58_v4 = vsub.f32 0.0, %v56_v2  ;;  %v59_v5 = vsub.f32 0.0, %v57_v3 }
  0x10   :  { %v52_v19 = vmul.f32 %v120_v11, %v44_v0  ;;  %v53_v23 = vmul.f32 %v121_v14, %v45_v1 }
  0x11   :  { %v60_v6 = vmul.f32 1.442695, %v58_v4  ;;  %v62_v7 = vmul.f32 1.442695, %v59_v5 }
  0x12   :  { %v54_v27 = vsub.f32 %v50_v18, %v52_v19  ;;  %v55_v30 = vsub.f32 %v51_v22, %v53_v23 }
  0x13   :  { %129 = vpow2.f32 %v60_v6 }
  0x14   :  { %131 = vpow2.f32 %v62_v7 }
  0x19   :  { %v130_v9 = vpop.eup %129 }
  0x1a   :  { %v132_v10 = vpop.eup %131  ;;  %v64_v12 = vadd.f32 1.0, %v130_v9  ;;  %v67_v13 = vmul.f32 -0.5, %v130_v9  ;;  %v70_v20 = vand.u32 2147483647, %v130_v9 }
  0x1b   :  { %v73_v15 = vadd.f32 1.0, %v132_v10  ;;  %v76_v16 = vmul.f32 -0.5, %v132_v10  ;;  %v79_v24 = vand.u32 2147483647, %v132_v10 }
  0x1c   :  { %133 = vlog2.f32 %v64_v12  ;;  %v68_v17 = vadd.f32 1.0, %v67_v13  ;;  %vm71_vm0 = vcmp.lt.f32.partialorder %v70_v20, 0.0004427343 }
  0x1d   :  { %135 = vlog2.f32 %v73_v15  ;;  %v77_v21 = vadd.f32 1.0, %v76_v16  ;;  %vm80_vm1 = vcmp.lt.f32.partialorder %v79_v24, 0.0004427343 }
  0x1e   :  { %v69_v25 = vmul.f32 %v130_v9, %v68_v17 }
  0x1f   :  { %v78_v28 = vmul.f32 %v132_v10, %v77_v21 }
  0x22   :  { %v134_v26 = vpop.eup %133 }
  0x23   :  { %v136_v29 = vpop.eup %135  ;;  %v66_v31 = vmul.f32 0.6931472, %v134_v26 }
  0x24   :  { %v75_v32 = vmul.f32 0.6931472, %v136_v29 }
  0x25   :  { %v72_v33 = vsel %vm71_vm0, %v69_v25, %v66_v31 }
  0x26   :  { %v81_v34 = vsel %vm80_vm1, %v78_v28, %v75_v32  ;;  %v82_v35 = vadd.f32 %v72_v33, %v54_v27 }
  0x27   :  { %v83_v36 = vadd.f32 %v81_v34, %v55_v30 }
  0x28   :  { %v84_v37 = vsub.f32 0.0, %v82_v35 }
  0x29   :  { %v85_v38 = vsub.f32 0.0, %v83_v36 }
  0x2a   :  { %v86_v39 = vmul.f32 1.442695, %v84_v37 }
  0x2b   :  { %v88_v40 = vmul.f32 1.442695, %v85_v38 }
  0x2c   :  { %137 = vpow2.f32 %v86_v39 }
  0x2d   :  { %139 = vpow2.f32 %v88_v40 }
  0x32   :  { %v138_v41 = vpop.eup %137 }
  0x33   :  { %v140_v42 = vpop.eup %139  ;;  %v90_v43 = vsub.f32 1.0, %v138_v41 }
  0x34   :  { %v91_v44 = vsub.f32 1.0, %v140_v42 }
  0x35   :  { %v92_v45 = vmul.f32 %v90_v43, %v90_v43 }
  0x36   :  { %v93_v46 = vmul.f32 %v91_v44, %v91_v44 }
  0x37   :  { %v94_v47 = vmul.f32 %v120_v11, %v92_v45 }
  0x38   :  { %v95_v48 = vmul.f32 %v121_v14, %v93_v46 }
  0x39   :  { %v96_v49 = vmul.f32 %v94_v47, %v82_v35 }
  0x3a   :  { %v97_v50 = vmul.f32 %v95_v48, %v83_v36 }
  0x3c   :  { %v98_v51 = vadd.f32 %v97_v50, %v96_v49 }
  0x3e   :  { %99 = vst [vmem:[#allocation7] sm:$0xff] %v98_v51 }
  0x3f   :  { %110 = dma.vmem_to_hbm [thread:$0]  %s106_s1, 128, %s108_s25, [#allocation4]  }
  0x40   :  { %217 = dma.done.wait [#allocation4], 128  }
  0x41   :  { %218 = vsyncadd [#allocation4], 4294967168 }
  0x42   :  { %115 = vsyncpa [#allocation3], 1 }
  0x43   :  { %116 = vsyncpa [#allocation6], 1 }
  0x44   :  { %117 = vsyncpa [#allocation4], 1 }

</bundles_post_ra>
